<compile_context>
chip_gen: v7x
topology: tpu7x:2x2x1
jax: 0.10.0
libtpu: 0.0.40
codegen_flags: <defaults>
</compile_context>

<pallas_src>
import functools

import jax
import jax.numpy as jnp
from jax.experimental import pallas as pl
from jax.experimental.pallas import tpu as pltpu

LEAKY_SLOPE = 0.2


# ----------------------------- Pallas kernel -------------------------------
def _z_network_kernel(x_ref, w1_ref, b1_ref, w2_ref, b2_ref,
                      wmu_ref, bmu_ref, wlv_ref, blv_ref, eps_ref,
                      z_ref, mu_ref, lv_ref, *, sample):
    def leaky(v):
        return jnp.where(v >= 0, v, LEAKY_SLOPE * v)

    x = x_ref[...]
    h = leaky(jnp.dot(x, w1_ref[...], preferred_element_type=jnp.float32)
              + b1_ref[...])
    h = leaky(jnp.dot(h, w2_ref[...], preferred_element_type=jnp.float32)
              + b2_ref[...])
    mu = jnp.dot(h, wmu_ref[...], preferred_element_type=jnp.float32) + bmu_ref[...]
    lv = jnp.dot(h, wlv_ref[...], preferred_element_type=jnp.float32) + blv_ref[...]

    mu_ref[...] = mu
    lv_ref[...] = lv
    if sample:
        z_ref[...] = eps_ref[...] * jnp.exp(0.5 * lv) + mu
    else:
        z_ref[...] = mu


def z_network_forward(inputs, params, eps, *, sample=True):
    """inputs: (B, nfeature, h_height, h_width) or already flat (B, Din)."""
    B = inputs.shape[0]
    x = inputs.reshape(B, -1).astype(jnp.float32)
    Din = x.shape[1]
    nf = params["w1"].shape[1]
    nz = params["wmu"].shape[1]

    # Tile only the batch dim; for small B a single full-array block is used
    # (legal because block dims equal the full array dims), for large B use
    # 128-row tiles so the batch axis pipelines / shards across cores.
    TB = B if B <= 128 else 128
    grid = (pl.cdiv(B, TB),)

    def full(shape):
        return pl.BlockSpec(shape, lambda i: (0, 0))

    def row(n):
        return pl.BlockSpec((TB, n), lambda i: (i, 0))

    out_sds = jax.ShapeDtypeStruct((B, nz), jnp.float32)

    z, mu, logvar = pl.pallas_call(
        functools.partial(_z_network_kernel, sample=sample),
        out_shape=(out_sds, out_sds, out_sds),
        grid=grid,
        in_specs=[
            row(Din),                                   # x
            full((Din, nf)), full((1, nf)),             # layer 1
            full((nf, nf)), full((1, nf)),              # layer 2
            full((nf, nz)), full((1, nz)),              # mu head
            full((nf, nz)), full((1, nz)),              # logvar head
            row(nz),                                    # eps
        ],
        out_specs=(row(nz), row(nz), row(nz)),
        compiler_params=pltpu.CompilerParams(
            dimension_semantics=("parallel",)),
    )(x, params["w1"], params["b1"], params["w2"], params["b2"],
      params["wmu"], params["bmu"], params["wlv"], params["blv"], eps)
    return z, mu, logvar


# ------------------------------- params -------------------------------------
class Opt:
    nfeature = 32
    h_height = 8
    h_width = 4
    nz = 32


def init_params(key, opt):
    Din = opt.nfeature * opt.h_height * opt.h_width
    nf, nz = opt.nfeature, opt.nz

    def nrm(k, shape, scale=0.05):
        return scale * jax.random.normal(k, shape, jnp.float32)

    ks = jax.random.split(key, 6)
    # PyTorch nn.Linear layout: weight (out, in), bias (out,)
    w1 = nrm(ks[0], (nf, Din)); b1 = nrm(ks[1], (nf,))
    w2 = nrm(ks[2], (nf, nf)); b2 = nrm(ks[3], (nf,))
    w3 = nrm(ks[4], (2 * nz, nf)); b3 = nrm(ks[5], (2 * nz,))

    # Pre-fold all weight transforms (transpose to (in, out), split the last
    # layer into interleaved mu / logvar heads, biases -> (1, out)).
    return {
        "w1": jnp.asarray(w1.T), "b1": b1.reshape(1, nf),
        "w2": jnp.asarray(w2.T), "b2": b2.reshape(1, nf),
        "wmu": jnp.asarray(w3[0::2, :].T), "bmu": b3[0::2].reshape(1, nz),
        "wlv": jnp.asarray(w3[1::2, :].T), "blv": b3[1::2].reshape(1, nz),
    }


# --------------------------------- main --------------------------------------
if __name__ == "__main__":
    opt = Opt()
    key = jax.random.PRNGKey(0)
    kp, kx, ke = jax.random.split(key, 3)
    params = init_params(kp, opt)

    B = 2
    inputs = jax.random.normal(
        kx, (B, opt.nfeature, opt.h_height, opt.h_width), jnp.float32)
    eps = jax.random.normal(ke, (B, opt.nz), jnp.float32)

    fwd = jax.jit(functools.partial(z_network_forward, sample=True))
    z, mu, logvar = fwd(inputs, params, eps)
    jax.block_until_ready((z, mu, logvar))

    # Plain-JAX reference (same math as the PyTorch module).
    x = inputs.reshape(B, -1)

    def leaky(v):
        return jnp.where(v >= 0, v, LEAKY_SLOPE * v)

    h = leaky(x @ params["w1"] + params["b1"])
    h = leaky(h @ params["w2"] + params["b2"])
    mu_ref = h @ params["wmu"] + params["bmu"]
    lv_ref = h @ params["wlv"] + params["blv"]
    z_ref = eps * jnp.exp(0.5 * lv_ref) + mu_ref

    assert z.shape == (B, opt.nz) and mu.shape == (B, opt.nz)
    assert logvar.shape == (B, opt.nz)
    assert jnp.isfinite(z).all() and jnp.isfinite(mu).all() and jnp.isfinite(logvar).all()
    assert jnp.allclose(mu, mu_ref, atol=1e-5), float(jnp.max(jnp.abs(mu - mu_ref)))
    assert jnp.allclose(logvar, lv_ref, atol=1e-5), float(jnp.max(jnp.abs(logvar - lv_ref)))
    assert jnp.allclose(z, z_ref, atol=1e-5), float(jnp.max(jnp.abs(z - z_ref)))
    print("KERNEL_OK")
</pallas_src>

<mosaic_0001>
module attributes {stable_mosaic.version = 11 : i64} {
  func.func @_z_network_kernel(%arg0: i32, %arg1: memref<2x1024xf32, #tpu.memory_space<vmem>>, %arg2: memref<1024x32xf32, #tpu.memory_space<vmem>>, %arg3: memref<1x32xf32, #tpu.memory_space<vmem>>, %arg4: memref<32x32xf32, #tpu.memory_space<vmem>>, %arg5: memref<1x32xf32, #tpu.memory_space<vmem>>, %arg6: memref<32x32xf32, #tpu.memory_space<vmem>>, %arg7: memref<1x32xf32, #tpu.memory_space<vmem>>, %arg8: memref<32x32xf32, #tpu.memory_space<vmem>>, %arg9: memref<1x32xf32, #tpu.memory_space<vmem>>, %arg10: memref<2x32xf32, #tpu.memory_space<vmem>>, %arg11: memref<2x32xf32, #tpu.memory_space<vmem>>, %arg12: memref<2x32xf32, #tpu.memory_space<vmem>>, %arg13: memref<2x32xf32, #tpu.memory_space<vmem>>) attributes {dimension_semantics = [#tpu.dimension_semantics<parallel>], iteration_bounds = array<i64: 1>, scalar_prefetch = 0 : i64, scratch_operands = 0 : i64, tpu.core_type = #tpu.core_type<tc>, window_params = [{transform_indices = @transform_0, window_bounds = array<i64: 2, 1024>}, {pipeline_mode = #tpu.pipeline_mode<synchronous>, transform_indices = @transform_1, window_bounds = array<i64: 1024, 32>}, {pipeline_mode = #tpu.pipeline_mode<synchronous>, transform_indices = @transform_2, window_bounds = array<i64: 1, 32>}, {pipeline_mode = #tpu.pipeline_mode<synchronous>, transform_indices = @transform_3, window_bounds = array<i64: 32, 32>}, {pipeline_mode = #tpu.pipeline_mode<synchronous>, transform_indices = @transform_4, window_bounds = array<i64: 1, 32>}, {pipeline_mode = #tpu.pipeline_mode<synchronous>, transform_indices = @transform_5, window_bounds = array<i64: 32, 32>}, {pipeline_mode = #tpu.pipeline_mode<synchronous>, transform_indices = @transform_6, window_bounds = array<i64: 1, 32>}, {pipeline_mode = #tpu.pipeline_mode<synchronous>, transform_indices = @transform_7, window_bounds = array<i64: 32, 32>}, {pipeline_mode = #tpu.pipeline_mode<synchronous>, transform_indices = @transform_8, window_bounds = array<i64: 1, 32>}, {transform_indices = @transform_9, window_bounds = array<i64: 2, 32>}, {transform_indices = @transform_10, window_bounds = array<i64: 2, 32>}, {transform_indices = @transform_11, window_bounds = array<i64: 2, 32>}, {transform_indices = @transform_12, window_bounds = array<i64: 2, 32>}]} {
    %c0 = arith.constant 0 : index
    %c0_0 = arith.constant 0 : index
    %0 = vector.load %arg1[%c0, %c0_0] : memref<2x1024xf32, #tpu.memory_space<vmem>>, vector<2x1024xf32>
    %c0_1 = arith.constant 0 : index
    %c0_2 = arith.constant 0 : index
    %1 = vector.load %arg2[%c0_1, %c0_2] : memref<1024x32xf32, #tpu.memory_space<vmem>>, vector<1024x32xf32>
    %cst = arith.constant dense<0.000000e+00> : vector<2x32xf32>
    %2 = tpu.matmul %0, %1, %cst {dimension_numbers = #tpu.dot_dimension_numbers<[1], [0], [0], [1], [0, 0, 1, 1], [], []>} : vector<2x1024xf32>, vector<1024x32xf32>, vector<2x32xf32> -> vector<2x32xf32>
    %c0_3 = arith.constant 0 : index
    %c0_4 = arith.constant 0 : index
    %3 = vector.load %arg3[%c0_3, %c0_4] : memref<1x32xf32, #tpu.memory_space<vmem>>, vector<1x32xf32>
    %4 = vector.broadcast %3 : vector<1x32xf32> to vector<2x32xf32>
    %5 = arith.addf %2, %4 : vector<2x32xf32>
    %cst_5 = arith.constant 0.000000e+00 : f32
    %6 = vector.broadcast %cst_5 : f32 to vector<2x32xf32>
    %7 = arith.cmpf oge, %5, %6 : vector<2x32xf32>
    %cst_6 = arith.constant 2.000000e-01 : f32
    %8 = vector.broadcast %cst_6 : f32 to vector<2x32xf32>
    %9 = arith.mulf %8, %5 : vector<2x32xf32>
    %10 = arith.select %7, %5, %9 : vector<2x32xi1>, vector<2x32xf32>
    %c0_7 = arith.constant 0 : index
    %c0_8 = arith.constant 0 : index
    %11 = vector.load %arg4[%c0_7, %c0_8] : memref<32x32xf32, #tpu.memory_space<vmem>>, vector<32x32xf32>
    %cst_9 = arith.constant dense<0.000000e+00> : vector<2x32xf32>
    %12 = tpu.matmul %10, %11, %cst_9 {dimension_numbers = #tpu.dot_dimension_numbers<[1], [0], [0], [1], [0, 0, 1, 1], [], []>} : vector<2x32xf32>, vector<32x32xf32>, vector<2x32xf32> -> vector<2x32xf32>
    %c0_10 = arith.constant 0 : index
    %c0_11 = arith.constant 0 : index
    %13 = vector.load %arg5[%c0_10, %c0_11] : memref<1x32xf32, #tpu.memory_space<vmem>>, vector<1x32xf32>
    %14 = vector.broadcast %13 : vector<1x32xf32> to vector<2x32xf32>
    %15 = arith.addf %12, %14 : vector<2x32xf32>
    %cst_12 = arith.constant 0.000000e+00 : f32
    %16 = vector.broadcast %cst_12 : f32 to vector<2x32xf32>
    %17 = arith.cmpf oge, %15, %16 : vector<2x32xf32>
    %cst_13 = arith.constant 2.000000e-01 : f32
    %18 = vector.broadcast %cst_13 : f32 to vector<2x32xf32>
    %19 = arith.mulf %18, %15 : vector<2x32xf32>
    %20 = arith.select %17, %15, %19 : vector<2x32xi1>, vector<2x32xf32>
    %c0_14 = arith.constant 0 : index
    %c0_15 = arith.constant 0 : index
    %21 = vector.load %arg6[%c0_14, %c0_15] : memref<32x32xf32, #tpu.memory_space<vmem>>, vector<32x32xf32>
    %cst_16 = arith.constant dense<0.000000e+00> : vector<2x32xf32>
    %22 = tpu.matmul %20, %21, %cst_16 {dimension_numbers = #tpu.dot_dimension_numbers<[1], [0], [0], [1], [0, 0, 1, 1], [], []>} : vector<2x32xf32>, vector<32x32xf32>, vector<2x32xf32> -> vector<2x32xf32>
    %c0_17 = arith.constant 0 : index
    %c0_18 = arith.constant 0 : index
    %23 = vector.load %arg7[%c0_17, %c0_18] : memref<1x32xf32, #tpu.memory_space<vmem>>, vector<1x32xf32>
    %24 = vector.broadcast %23 : vector<1x32xf32> to vector<2x32xf32>
    %25 = arith.addf %22, %24 : vector<2x32xf32>
    %c0_19 = arith.constant 0 : index
    %c0_20 = arith.constant 0 : index
    %26 = vector.load %arg8[%c0_19, %c0_20] : memref<32x32xf32, #tpu.memory_space<vmem>>, vector<32x32xf32>
    %cst_21 = arith.constant dense<0.000000e+00> : vector<2x32xf32>
    %27 = tpu.matmul %20, %26, %cst_21 {dimension_numbers = #tpu.dot_dimension_numbers<[1], [0], [0], [1], [0, 0, 1, 1], [], []>} : vector<2x32xf32>, vector<32x32xf32>, vector<2x32xf32> -> vector<2x32xf32>
    %c0_22 = arith.constant 0 : index
    %c0_23 = arith.constant 0 : index
    %28 = vector.load %arg9[%c0_22, %c0_23] : memref<1x32xf32, #tpu.memory_space<vmem>>, vector<1x32xf32>
    %29 = vector.broadcast %28 : vector<1x32xf32> to vector<2x32xf32>
    %30 = arith.addf %27, %29 : vector<2x32xf32>
    %c0_24 = arith.constant 0 : index
    %c0_25 = arith.constant 0 : index
    %31 = vector.load %arg12[%c0_24, %c0_25] : memref<2x32xf32, #tpu.memory_space<vmem>>, vector<2x32xf32>
    tpu.vector_store %arg12[%c0_24, %c0_25], %25 {strides = array<i32>} : memref<2x32xf32, #tpu.memory_space<vmem>>, vector<2x32xf32>,
    %c0_26 = arith.constant 0 : index
    %c0_27 = arith.constant 0 : index
    %32 = vector.load %arg13[%c0_26, %c0_27] : memref<2x32xf32, #tpu.memory_space<vmem>>, vector<2x32xf32>
    tpu.vector_store %arg13[%c0_26, %c0_27], %30 {strides = array<i32>} : memref<2x32xf32, #tpu.memory_space<vmem>>, vector<2x32xf32>,
    %c0_28 = arith.constant 0 : index
    %c0_29 = arith.constant 0 : index
    %33 = vector.load %arg10[%c0_28, %c0_29] : memref<2x32xf32, #tpu.memory_space<vmem>>, vector<2x32xf32>
    %cst_30 = arith.constant 5.000000e-01 : f32
    %34 = vector.broadcast %cst_30 : f32 to vector<2x32xf32>
    %35 = arith.mulf %34, %30 : vector<2x32xf32>
    %36 = math.exp %35 : vector<2x32xf32>
    %37 = arith.mulf %33, %36 : vector<2x32xf32>
    %38 = arith.addf %37, %25 : vector<2x32xf32>
    %c0_31 = arith.constant 0 : index
    %c0_32 = arith.constant 0 : index
    %39 = vector.load %arg11[%c0_31, %c0_32] : memref<2x32xf32, #tpu.memory_space<vmem>>, vector<2x32xf32>
    tpu.vector_store %arg11[%c0_31, %c0_32], %38 {strides = array<i32>} : memref<2x32xf32, #tpu.memory_space<vmem>>, vector<2x32xf32>,
    return
  }
  func.func @transform_0(%arg0: i32) -> (i32, i32) {
    %c0_i32 = arith.constant 0 : i32
    %c0_i32_0 = arith.constant 0 : i32
    return %arg0, %c0_i32 : i32, i32
  }
  func.func @transform_1(%arg0: i32) -> (i32, i32) {
    %c0_i32 = arith.constant 0 : i32
    %c0_i32_0 = arith.constant 0 : i32
    %c0_i32_1 = arith.constant 0 : i32
    return %c0_i32, %c0_i32_0 : i32, i32
  }
  func.func @transform_2(%arg0: i32) -> (i32, i32) {
    %c0_i32 = arith.constant 0 : i32
    %c0_i32_0 = arith.constant 0 : i32
    %c0_i32_1 = arith.constant 0 : i32
    return %c0_i32, %c0_i32_0 : i32, i32
  }
  func.func @transform_3(%arg0: i32) -> (i32, i32) {
    %c0_i32 = arith.constant 0 : i32
    %c0_i32_0 = arith.constant 0 : i32
    %c0_i32_1 = arith.constant 0 : i32
    return %c0_i32, %c0_i32_0 : i32, i32
  }
  func.func @transform_4(%arg0: i32) -> (i32, i32) {
    %c0_i32 = arith.constant 0 : i32
    %c0_i32_0 = arith.constant 0 : i32
    %c0_i32_1 = arith.constant 0 : i32
    return %c0_i32, %c0_i32_0 : i32, i32
  }
  func.func @transform_5(%arg0: i32) -> (i32, i32) {
    %c0_i32 = arith.constant 0 : i32
    %c0_i32_0 = arith.constant 0 : i32
    %c0_i32_1 = arith.constant 0 : i32
    return %c0_i32, %c0_i32_0 : i32, i32
  }
  func.func @transform_6(%arg0: i32) -> (i32, i32) {
    %c0_i32 = arith.constant 0 : i32
    %c0_i32_0 = arith.constant 0 : i32
    %c0_i32_1 = arith.constant 0 : i32
    return %c0_i32, %c0_i32_0 : i32, i32
  }
  func.func @transform_7(%arg0: i32) -> (i32, i32) {
    %c0_i32 = arith.constant 0 : i32
    %c0_i32_0 = arith.constant 0 : i32
    %c0_i32_1 = arith.constant 0 : i32
    return %c0_i32, %c0_i32_0 : i32, i32
  }
  func.func @transform_8(%arg0: i32) -> (i32, i32) {
    %c0_i32 = arith.constant 0 : i32
    %c0_i32_0 = arith.constant 0 : i32
    %c0_i32_1 = arith.constant 0 : i32
    return %c0_i32, %c0_i32_0 : i32, i32
  }
  func.func @transform_9(%arg0: i32) -> (i32, i32) {
    %c0_i32 = arith.constant 0 : i32
    %c0_i32_0 = arith.constant 0 : i32
    return %arg0, %c0_i32 : i32, i32
  }
  func.func @transform_10(%arg0: i32) -> (i32, i32) {
    %c0_i32 = arith.constant 0 : i32
    %c0_i32_0 = arith.constant 0 : i32
    return %arg0, %c0_i32 : i32, i32
  }
  func.func @transform_11(%arg0: i32) -> (i32, i32) {
    %c0_i32 = arith.constant 0 : i32
    %c0_i32_0 = arith.constant 0 : i32
    return %arg0, %c0_i32 : i32, i32
  }
  func.func @transform_12(%arg0: i32) -> (i32, i32) {
    %c0_i32 = arith.constant 0 : i32
    %c0_i32_0 = arith.constant 0 : i32
    return %arg0, %c0_i32 : i32, i32
  }
}

</mosaic_0001>

<bundles_post_ra>
// kernel: z_network_forward.1
= control target key start
LH: loop header
LB: loop body
LE: loop exit
PB: predicated region body
PF: predicated region fallthrough
CT: control target
= control target key end

     0   :  { %18 = vsyncpa [#allocation3], 0  ;;  %v1230_v47 = vmov 1983009808   ;;  %v183_v49 = vlaneseq  ;;  %s1806_s0 = inlined_call_operand.vmem [shape: f32[2,1024], index: 0, kind: input, shape index: {}]   ;;  %s1807_s1 = inlined_call_operand.vmem [shape: f32[1024,32], index: 1, kind: input, shape index: {}]   ;;  %s1808_s2 = inlined_call_operand.vmem [shape: f32[1,32], index: 2, kind: input, shape index: {}]   ;;  %s1809_s3 = inlined_call_operand.vmem [shape: f32[32,32], index: 3, kind: input, shape index: {}]   ;;  %s1810_s4 = inlined_call_operand.vmem [shape: f32[1,32], index: 4, kind: input, shape index: {}]   ;;  %s1811_s5 = inlined_call_operand.vmem [shape: f32[32,32], index: 5, kind: input, shape index: {}]   ;;  %s1812_s6 = inlined_call_operand.vmem [shape: f32[1,32], index: 6, kind: input, shape index: {}]   ;;  %s1813_s7 = inlined_call_operand.vmem [shape: f32[32,32], index: 7, kind: input, shape index: {}]   ;;  %s1814_s8 = inlined_call_operand.vmem [shape: f32[1,32], index: 8, kind: input, shape index: {}]   ;;  %s1815_s9 = inlined_call_operand.vmem [shape: f32[2,32], index: 9, kind: input, shape index: {}]   ;;  %s1816_s10 = inlined_call_operand.hbm [shape: f32[2,32], index: 10, kind: output, shape index: {0}]   ;;  %s1817_s11 = inlined_call_operand.hbm [shape: f32[2,32], index: 11, kind: output, shape index: {1}]   ;;  %s1818_s12 = inlined_call_operand.hbm [shape: f32[2,32], index: 12, kind: output, shape index: {2}]  }
   0x1   :  { %v58_v0 = vld [vmem:[%s1807_s1 + $0x80] sm:$0xff]  ;;  %v59_v1 = vld [vmem:[%s1807_s1 + $0x88] sm:$0xff]  ;;  %v60_v11 = vld [vmem:[%s1807_s1 + $0x90] sm:$0xff]  ;;  %v181_v48 = vunpack.c.l.s4 %v1230_v47 }
   0x2   :  { %v42_v2 = vld [vmem:[%s1807_s1] sm:$0xff]  ;;  %v1003_v3 = vpack.c.bf16 %v59_v1, %v58_v0  ;;  %v43_v4 = vld [vmem:[%s1807_s1 + $0x8] sm:$0xff]  ;;  %v61_v13 = vld [vmem:[%s1807_s1 + $0x98] sm:$0xff]  ;;  %v184_v0 = vshrl.u32 %v183_v49, 7 }
   0x3   :  { %v90_v5 = vld [vmem:[%s1807_s1 + $0x180] sm:$0xff]  ;;  %v91_v6 = vld [vmem:[%s1807_s1 + $0x188] sm:$0xff]  ;;  %v1005_v7 = vpack.c.bf16 %v43_v4, %v42_v2  ;;  %v44_v14 = vld [vmem:[%s1807_s1 + $0x10] sm:$0xff]  ;;  %v1007_v16 = vpack.c.bf16 %v61_v13, %v60_v11  ;;  %v182_v63 = vunpack.c.0.s8 %v181_v48 }
   0x4   :  { %v1035_v8 = vpack.c.bf16 %v91_v6, %v90_v5  ;;  %v74_v9 = vld [vmem:[%s1807_s1 + $0x100] sm:$0xff]  ;;  %v75_v10 = vld [vmem:[%s1807_s1 + $0x108] sm:$0xff]  ;;  %1004 = vmatprep.subr.bf16.mxu0 %v1003_v3  ;;  %v45_v15 = vld [vmem:[%s1807_s1 + $0x18] sm:$0xff] }
   0x5   :  { %v1037_v12 = vpack.c.bf16 %v75_v10, %v74_v9  ;;  %1006 = vmatpush3.bf16.msra.mxu0 %v1005_v7  ;;  %v1009_v17 = vpack.c.bf16 %v45_v15, %v44_v14  ;;  %v92_v18 = vld [vmem:[%s1807_s1 + $0x190] sm:$0xff]  ;;  %v93_v19 = vld [vmem:[%s1807_s1 + $0x198] sm:$0xff]  ;;  %v62_v23 = vld [vmem:[%s1807_s1 + $0xa0] sm:$0xff]  ;;  %v1452_v13 = vsub.s32 %v182_v63, %v184_v0 }
   0x6   :  { %1036 = vmatprep.subr.bf16.mxu1 %v1035_v8  ;;  %v76_v20 = vld [vmem:[%s1807_s1 + $0x110] sm:$0xff]  ;;  %v1039_v21 = vpack.c.bf16 %v93_v19, %v92_v18  ;;  %v77_v22 = vld [vmem:[%s1807_s1 + $0x118] sm:$0xff]  ;;  %v63_v24 = vld [vmem:[%s1807_s1 + $0xa8] sm:$0xff]  ;;  %1008 = vmatprep.subr.bf16.mxu0 %v1007_v16 }
   0x7   :  { %1038 = vmatpush3.bf16.msra.mxu1 %v1037_v12  ;;  %v1041_v25 = vpack.c.bf16 %v77_v22, %v76_v20  ;;  %v1011_v26 = vpack.c.bf16 %v63_v24, %v62_v23  ;;  %v46_v27 = vld [vmem:[%s1807_s1 + $0x20] sm:$0xff]  ;;  %v47_v28 = vld [vmem:[%s1807_s1 + $0x28] sm:$0xff]  ;;  %v64_v35 = vld [vmem:[%s1807_s1 + $0xb0] sm:$0xff] }
   0x8   :  { %v94_v29 = vld [vmem:[%s1807_s1 + $0x1a0] sm:$0xff]  ;;  %1040 = vmatprep.subr.bf16.mxu1 %v1039_v21  ;;  %v95_v30 = vld [vmem:[%s1807_s1 + $0x1a8] sm:$0xff]  ;;  %v1013_v33 = vpack.c.bf16 %v47_v28, %v46_v27  ;;  %v65_v36 = vld [vmem:[%s1807_s1 + $0xb8] sm:$0xff] }
   0x9   :  { %v78_v31 = vld [vmem:[%s1807_s1 + $0x120] sm:$0xff]  ;;  %v79_v32 = vld [vmem:[%s1807_s1 + $0x128] sm:$0xff]  ;;  %1010 = vmatpush3.bf16.msra.mxu0 %v1009_v17  ;;  %v1043_v34 = vpack.c.bf16 %v95_v30, %v94_v29  ;;  %v48_v37 = vld [vmem:[%s1807_s1 + $0x30] sm:$0xff]  ;;  %v1015_v39 = vpack.c.bf16 %v65_v36, %v64_v35 }
   0xa   :  { %1012 = vmatprep.subr.bf16.mxu0 %v1011_v26  ;;  %v1045_v38 = vpack.c.bf16 %v79_v32, %v78_v31  ;;  %v49_v40 = vld [vmem:[%s1807_s1 + $0x38] sm:$0xff]  ;;  %v96_v41 = vld [vmem:[%s1807_s1 + $0x1b0] sm:$0xff]  ;;  %v66_v46 = vld [vmem:[%s1807_s1 + $0xc0] sm:$0xff] }
   0xb   :  { %1042 = vmatpush3.bf16.msra.mxu1 %v1041_v25  ;;  %v97_v42 = vld [vmem:[%s1807_s1 + $0x1b8] sm:$0xff]  ;;  %v80_v44 = vld [vmem:[%s1807_s1 + $0x130] sm:$0xff]  ;;  %v67_v50 = vld [vmem:[%s1807_s1 + $0xc8] sm:$0xff]  ;;  %v1017_v51 = vpack.c.bf16 %v49_v40, %v48_v37 }
   0xc   :  { %1044 = vmatprep.subr.bf16.mxu1 %v1043_v34  ;;  %v1047_v43 = vpack.c.bf16 %v97_v42, %v96_v41  ;;  %v81_v45 = vld [vmem:[%s1807_s1 + $0x138] sm:$0xff]  ;;  %v98_v52 = vld [vmem:[%s1807_s1 + $0x1c0] sm:$0xff]  ;;  %v99_v53 = vld [vmem:[%s1807_s1 + $0x1c8] sm:$0xff]  ;;  %v1019_v55 = vpack.c.bf16 %v67_v50, %v66_v46 }
   0xd   :  { %1014 = vmatpush3.bf16.msra.mxu0 %v1013_v33  ;;  %v1049_v54 = vpack.c.bf16 %v81_v45, %v80_v44  ;;  %v50_v56 = vld [vmem:[%s1807_s1 + $0x40] sm:$0xff]  ;;  %v51_v57 = vld [vmem:[%s1807_s1 + $0x48] sm:$0xff]  ;;  %v1051_v59 = vpack.c.bf16 %v99_v53, %v98_v52  ;;  %v68_v61 = vld [vmem:[%s1807_s1 + $0xd0] sm:$0xff] }
   0xe   :  { %1016 = vmatprep.subr.bf16.mxu0 %v1015_v39  ;;  %v82_v58 = vld [vmem:[%s1807_s1 + $0x140] sm:$0xff]  ;;  %v83_v60 = vld [vmem:[%s1807_s1 + $0x148] sm:$0xff]  ;;  %v69_v62 = vld [vmem:[%s1807_s1 + $0xd8] sm:$0xff]  ;;  %v1021_v3 = vpack.c.bf16 %v51_v57, %v50_v56 }
   0xf   :  { %1046 = vmatpush3.bf16.msra.mxu1 %v1045_v38  ;;  %v100_v1 = vld [vmem:[%s1807_s1 + $0x1d0] sm:$0xff]  ;;  %v101_v2 = vld [vmem:[%s1807_s1 + $0x1d8] sm:$0xff]  ;;  %v1053_v4 = vpack.c.bf16 %v83_v60, %v82_v58  ;;  %v1023_v5 = vpack.c.bf16 %v69_v62, %v68_v61  ;;  %v70_v11 = vld [vmem:[%s1807_s1 + $0xe0] sm:$0xff] }
  0x10   :  { %1048 = vmatprep.subr.bf16.mxu1 %v1047_v43  ;;  %v52_v6 = vld [vmem:[%s1807_s1 + $0x50] sm:$0xff]  ;;  %v53_v7 = vld [vmem:[%s1807_s1 + $0x58] sm:$0xff]  ;;  %v1055_v9 = vpack.c.bf16 %v101_v2, %v100_v1  ;;  %v71_v12 = vld [vmem:[%s1807_s1 + $0xe8] sm:$0xff] }
  0x11   :  { %1018 = vmatpush3.bf16.msra.mxu0 %v1017_v51  ;;  %v84_v8 = vld [vmem:[%s1807_s1 + $0x150] sm:$0xff]  ;;  %v85_v10 = vld [vmem:[%s1807_s1 + $0x158] sm:$0xff]  ;;  %v102_v14 = vld [vmem:[%s1807_s1 + $0x1e0] sm:$0xff]  ;;  %v1025_v16 = vpack.c.bf16 %v53_v7, %v52_v6  ;;  %v1027_v19 = vpack.c.bf16 %v71_v12, %v70_v11 }
  0x12   :  { %1020 = vmatprep.subr.bf16.mxu0 %v1019_v55  ;;  %v103_v15 = vld [vmem:[%s1807_s1 + $0x1e8] sm:$0xff]  ;;  %v54_v17 = vld [vmem:[%s1807_s1 + $0x60] sm:$0xff]  ;;  %v1057_v18 = vpack.c.bf16 %v85_v10, %v84_v8  ;;  %v72_v25 = vld [vmem:[%s1807_s1 + $0xf0] sm:$0xff] }
  0x13   :  { %1050 = vmatpush3.bf16.msra.mxu1 %v1049_v54  ;;  %v55_v20 = vld [vmem:[%s1807_s1 + $0x68] sm:$0xff]  ;;  %v86_v21 = vld [vmem:[%s1807_s1 + $0x160] sm:$0xff]  ;;  %v1059_v23 = vpack.c.bf16 %v103_v15, %v102_v14  ;;  %v73_v26 = vld [vmem:[%s1807_s1 + $0xf8] sm:$0xff] }
  0x14   :  { %1052 = vmatprep.subr.bf16.mxu1 %v1051_v59  ;;  %v40_v22 = vld [vmem:[%s1806_s0] sm:$0xff]  ;;  %v87_v24 = vld [vmem:[%s1807_s1 + $0x168] sm:$0xff]  ;;  %v104_v29 = vld [vmem:[%s1807_s1 + $0x1f0] sm:$0xff]  ;;  %v1029_v31 = vpack.c.bf16 %v55_v20, %v54_v17  ;;  %v1031_v35 = vpack.c.bf16 %v73_v26, %v72_v25 }
  0x15   :  { %1022 = vmatpush3.bf16.msra.mxu0 %v1021_v3  ;;  %v186_v27 = vrot.slane %v40_v22, %v1452_v13  ;;  %v179_v28 = vcombine.high %v40_v22, %v40_v22  ;;  %v105_v30 = vld [vmem:[%s1807_s1 + $0x1f8] sm:$0xff]  ;;  %v1061_v34 = vpack.c.bf16 %v87_v24, %v86_v21  ;;  %v56_v36 = vld [vmem:[%s1807_s1 + $0x70] sm:$0xff]  ;;  %v122_v41 = vld [vmem:[%s1807_s1 + $0x280] sm:$0xff] }
  0x16   :  { %1024 = vmatprep.subr.bf16.mxu0 %v1023_v5  ;;  %v57_v37 = vld [vmem:[%s1807_s1 + $0x78] sm:$0xff]  ;;  %v88_v38 = vld [vmem:[%s1807_s1 + $0x170] sm:$0xff]  ;;  %v1063_v39 = vpack.c.bf16 %v105_v30, %v104_v29  ;;  %v123_v42 = vld [vmem:[%s1807_s1 + $0x288] sm:$0xff] }
  0x17   :  { %1054 = vmatpush3.bf16.msra.mxu1 %v1053_v4  ;;  %v194_v32 = vcombine.high %v186_v27, %v186_v27  ;;  %v193_v33 = vrot.slane %v179_v28, %v1452_v13  ;;  %v89_v40 = vld [vmem:[%s1807_s1 + $0x178] sm:$0xff]  ;;  %v154_v44 = vld [vmem:[%s1807_s1 + $0x380] sm:$0xff]  ;;  %v155_v45 = vld [vmem:[%s1807_s1 + $0x388] sm:$0xff]  ;;  %v1033_v46 = vpack.c.bf16 %v57_v37, %v56_v36  ;;  %v1067_v48 = vpack.c.bf16 %v123_v42, %v122_v41 }
  0x18   :  { %1056 = vmatprep.subr.bf16.mxu1 %v1055_v9  ;;  %v1065_v47 = vpack.c.bf16 %v89_v40, %v88_v38  ;;  %v106_v49 = vld [vmem:[%s1807_s1 + $0x200] sm:$0xff]  ;;  %v107_v50 = vld [vmem:[%s1807_s1 + $0x208] sm:$0xff]  ;;  %v1099_v52 = vpack.c.bf16 %v155_v45, %v154_v44  ;;  %v124_v54 = vld [vmem:[%s1807_s1 + $0x290] sm:$0xff] }
  0x19   :  { %1026 = vmatpush3.bf16.msra.mxu0 %v1025_v16  ;;  %285 = vmatprep.mubr.f32.mxu0 %v194_v32  ;;  %v195_v43 = vcombine.high %v193_v33, %v193_v33  ;;  %v138_v51 = vld [vmem:[%s1807_s1 + $0x300] sm:$0xff]  ;;  %v139_v53 = vld [vmem:[%s1807_s1 + $0x308] sm:$0xff]  ;;  %v125_v55 = vld [vmem:[%s1807_s1 + $0x298] sm:$0xff]  ;;  %v1069_v58 = vpack.c.bf16 %v107_v50, %v106_v49 }
  0x1a   :  { %1028 = vmatprep.subr.bf16.mxu0 %v1027_v19  ;;  %v156_v56 = vld [vmem:[%s1807_s1 + $0x390] sm:$0xff]  ;;  %v157_v57 = vld [vmem:[%s1807_s1 + $0x398] sm:$0xff]  ;;  %v1101_v59 = vpack.c.bf16 %v139_v53, %v138_v51  ;;  %v1071_v60 = vpack.c.bf16 %v125_v55, %v124_v54  ;;  %v126_v2 = vld [vmem:[%s1807_s1 + $0x2a0] sm:$0xff] }
  0x1b   :  { %1058 = vmatpush3.bf16.msra.mxu1 %v1057_v18  ;;  %355 = vmatprep.mubr.f32.mxu1 %v195_v43  ;;  %v108_v61 = vld [vmem:[%s1807_s1 + $0x210] sm:$0xff]  ;;  %v109_v62 = vld [vmem:[%s1807_s1 + $0x218] sm:$0xff]  ;;  %v1103_v0 = vpack.c.bf16 %v157_v57, %v156_v56  ;;  %v127_v3 = vld [vmem:[%s1807_s1 + $0x2a8] sm:$0xff] }
  0x1c   :  { %1060 = vmatprep.subr.bf16.mxu1 %v1059_v23  ;;  %v140_v63 = vld [vmem:[%s1807_s1 + $0x310] sm:$0xff]  ;;  %v141_v1 = vld [vmem:[%s1807_s1 + $0x318] sm:$0xff]  ;;  %v158_v4 = vld [vmem:[%s1807_s1 + $0x3a0] sm:$0xff]  ;;  %v1073_v6 = vpack.c.bf16 %v109_v62, %v108_v61  ;;  %v1075_v8 = vpack.c.bf16 %v127_v3, %v126_v2 }
  0x1d   :  { %1030 = vmatpush3.bf16.msra.mxu0 %v1029_v31  ;;  %v159_v5 = vld [vmem:[%s1807_s1 + $0x3a8] sm:$0xff]  ;;  %v1105_v7 = vpack.c.bf16 %v141_v1, %v140_v63  ;;  %v110_v9 = vld [vmem:[%s1807_s1 + $0x220] sm:$0xff]  ;;  %v128_v15 = vld [vmem:[%s1807_s1 + $0x2b0] sm:$0xff] }
  0x1e   :  { %1032 = vmatprep.subr.bf16.mxu0 %v1031_v35  ;;  %v111_v10 = vld [vmem:[%s1807_s1 + $0x228] sm:$0xff]  ;;  %v142_v11 = vld [vmem:[%s1807_s1 + $0x320] sm:$0xff]  ;;  %v1107_v12 = vpack.c.bf16 %v159_v5, %v158_v4  ;;  %v129_v16 = vld [vmem:[%s1807_s1 + $0x2b8] sm:$0xff] }
  0x1f   :  { %1062 = vmatpush3.bf16.msra.mxu1 %v1061_v34  ;;  %v143_v14 = vld [vmem:[%s1807_s1 + $0x328] sm:$0xff]  ;;  %v160_v17 = vld [vmem:[%s1807_s1 + $0x3b0] sm:$0xff]  ;;  %v161_v18 = vld [vmem:[%s1807_s1 + $0x3b8] sm:$0xff]  ;;  %v1077_v19 = vpack.c.bf16 %v111_v10, %v110_v9  ;;  %v1079_v22 = vpack.c.bf16 %v129_v16, %v128_v15 }
  0x20   :  { %1064 = vmatprep.subr.bf16.mxu1 %v1063_v39  ;;  %v112_v20 = vld [vmem:[%s1807_s1 + $0x230] sm:$0xff]  ;;  %v1109_v21 = vpack.c.bf16 %v143_v14, %v142_v11  ;;  %v113_v23 = vld [vmem:[%s1807_s1 + $0x238] sm:$0xff]  ;;  %v1111_v26 = vpack.c.bf16 %v161_v18, %v160_v17  ;;  %v131_v28 = vld [vmem:[%s1807_s1 + $0x2c8] sm:$0xff] }
  0x21   :  { %1034 = vmatpush3.bf16.msra.mxu0 %v1033_v46  ;;  %v144_v24 = vld [vmem:[%s1807_s1 + $0x330] sm:$0xff]  ;;  %v145_v25 = vld [vmem:[%s1807_s1 + $0x338] sm:$0xff]  ;;  %v162_v29 = vld [vmem:[%s1807_s1 + $0x3c0] sm:$0xff] }
  0x22   :  { %1068 = vmatprep.subr.bf16.mxu0 %v1067_v48  ;;  %v163_v30 = vld [vmem:[%s1807_s1 + $0x3c8] sm:$0xff] }
  0x23   :  { %1066 = vmatpush3.bf16.msra.mxu1 %v1065_v47  ;;  %v41_v31 = vld [vmem:[%s1806_s0 + $0x8] sm:$0xff] }
  0x24   :  { %1100 = vmatprep.subr.bf16.mxu1 %v1099_v52  ;;  %286 = vmatmul.mubr.f32.vlgmr.msra.gmra.mrb[0].mxu0 %v186_v27  ;;  %v130_v27 = vld [vmem:[%s1807_s1 + $0x2c0] sm:$0xff] }
  0x25   :  { %1070 = vmatpush3.bf16.msra.mxu0 %v1069_v58 }
  0x26   :  { %356 = vmatmul.mubr.f32.vlgmr.msra.gmra.mrb[0].mxu1 %v193_v33  ;;  %1072 = vmatprep.subr.bf16.mxu0 %v1071_v60 }
  0x27   :  { %1102 = vmatpush3.bf16.msra.mxu1 %v1101_v59 }
  0x28   :  { %1104 = vmatprep.subr.bf16.mxu1 %v1103_v0 }
  0x29   :  { %1074 = vmatpush3.bf16.msra.mxu0 %v1073_v6 }
  0x2a   :  { %1076 = vmatprep.subr.bf16.mxu0 %v1075_v8 }
  0x2b   :  { %1106 = vmatpush3.bf16.msra.mxu1 %v1105_v7 }
  0x2c   :  { %1108 = vmatprep.subr.bf16.mxu1 %v1107_v12 }
  0x2d   :  { %19 = vsyncpa [#allocation5], 0  ;;  %1078 = vmatpush3.bf16.msra.mxu0 %v1077_v19  ;;  %v1081_v32 = vpack.c.bf16 %v113_v23, %v112_v20  ;;  %v1613_v33 = vrot.slane %v41_v31, %v1452_v13  ;;  %v196_v34 = vcombine.high %v41_v31, %v41_v31  ;;  %v1113_v35 = vpack.c.bf16 %v145_v25, %v144_v24  ;;  %v114_v37 = vld [vmem:[%s1807_s1 + $0x240] sm:$0xff]  ;;  %v115_v38 = vld [vmem:[%s1807_s1 + $0x248] sm:$0xff]  ;;  %s1234_s14 = smov [#allocation4]   ;;  %s1235_s15 = smov [#allocation6]  }
  0x2e   :  { %1080 = vmatprep.subr.bf16.mxu0 %v1079_v22  ;;  %v1083_v36 = vpack.c.bf16 %v131_v28, %v130_v27  ;;  %v146_v39 = vld [vmem:[%s1807_s1 + $0x340] sm:$0xff]  ;;  %v1115_v40 = vpack.c.bf16 %v163_v30, %v162_v29  ;;  %v147_v41 = vld [vmem:[%s1807_s1 + $0x348] sm:$0xff]  ;;  %v132_v42 = vld [vmem:[%s1807_s1 + $0x2d0] sm:$0xff]  ;;  %v1085_v48 = vpack.c.bf16 %v115_v38, %v114_v37  ;;  %v1231_v22 = vmov 0.0|0.0   ;;  %s793_s16 = sshll.u32 %s1235_s15, 4  ;;  %s1757_s16 = int_to_ptr.vmem [resolvable:$true] %s793_s16 }
  0x2f   :  { %1110 = vmatpush3.bf16.msra.mxu1 %v1109_v21  ;;  %v133_v43 = vld [vmem:[%s1807_s1 + $0x2d8] sm:$0xff]  ;;  %v211_v44 = vcombine.high %v1613_v33, %v1613_v33  ;;  %v210_v45 = vrot.slane %v196_v34, %v1452_v13  ;;  %v164_v46 = vld [vmem:[%s1807_s1 + $0x3d0] sm:$0xff]  ;;  %v1117_v50 = vpack.c.bf16 %v147_v41, %v146_v39  ;;  %v134_v56 = vld [vmem:[%s1807_s1 + $0x2e0] sm:$0xff]  ;;  %vm1232_vm0 = vmmov 0  }
  0x30   :  { %1112 = vmatprep.subr.bf16.mxu1 %v1111_v26  ;;  %v165_v47 = vld [vmem:[%s1807_s1 + $0x3d8] sm:$0xff]  ;;  %v1087_v51 = vpack.c.bf16 %v133_v43, %v132_v42  ;;  %v116_v13 = vld [vmem:[%s1807_s1 + $0x250] sm:$0xff]  ;;  %v135_v57 = vld [vmem:[%s1807_s1 + $0x2e8] sm:$0xff]  ;;  %v1233_v26 = vmov 0.0   ;;  %vm515_vm2 = vcmask 261120   ;;  %vm757_vm4 = vcmask 254976  }
  0x31   :  { %1082 = vmatpush3.bf16.msra.mxu0 %v1081_v32  ;;  %425 = vmatprep.mubr.f32.mxu0 %v211_v44  ;;  %v212_v49 = vcombine.high %v210_v45, %v210_v45  ;;  %v117_v52 = vld [vmem:[%s1807_s1 + $0x258] sm:$0xff]  ;;  %v148_v53 = vld [vmem:[%s1807_s1 + $0x350] sm:$0xff]  ;;  %v1119_v54 = vpack.c.bf16 %v165_v47, %v164_v46  ;;  %v166_v58 = vld [vmem:[%s1807_s1 + $0x3e0] sm:$0xff]  ;;  %v1091_v62 = vpack.c.bf16 %v135_v57, %v134_v56 }
  0x32   :  { %1084 = vmatprep.subr.bf16.mxu0 %v1083_v36  ;;  %v149_v55 = vld [vmem:[%s1807_s1 + $0x358] sm:$0xff]  ;;  %v167_v59 = vld [vmem:[%s1807_s1 + $0x3e8] sm:$0xff]  ;;  %v1089_v60 = vpack.c.bf16 %v117_v52, %v116_v13  ;;  %v118_v63 = vld [vmem:[%s1807_s1 + $0x260] sm:$0xff] }
  0x33   :  { %1114 = vmatpush3.bf16.msra.mxu1 %v1113_v35  ;;  %495 = vmatprep.mubr.f32.mxu1 %v212_v49  ;;  %v1121_v61 = vpack.c.bf16 %v149_v55, %v148_v53  ;;  %v119_v0 = vld [vmem:[%s1807_s1 + $0x268] sm:$0xff]  ;;  %v150_v1 = vld [vmem:[%s1807_s1 + $0x360] sm:$0xff]  ;;  %v1123_v2 = vpack.c.bf16 %v167_v59, %v166_v58  ;;  %v136_v4 = vld [vmem:[%s1807_s1 + $0x2f0] sm:$0xff] }
  0x34   :  { %1116 = vmatprep.subr.bf16.mxu1 %v1115_v40  ;;  %v151_v3 = vld [vmem:[%s1807_s1 + $0x368] sm:$0xff]  ;;  %v137_v5 = vld [vmem:[%s1807_s1 + $0x2f8] sm:$0xff]  ;;  %v168_v6 = vld [vmem:[%s1807_s1 + $0x3f0] sm:$0xff]  ;;  %v1093_v8 = vpack.c.bf16 %v119_v0, %v118_v63 }
  0x35   :  { %1086 = vmatpush3.bf16.msra.mxu0 %v1085_v48  ;;  %v169_v7 = vld [vmem:[%s1807_s1 + $0x3f8] sm:$0xff]  ;;  %v1125_v9 = vpack.c.bf16 %v151_v3, %v150_v1  ;;  %v1095_v10 = vpack.c.bf16 %v137_v5, %v136_v4  ;;  %v120_v11 = vld [vmem:[%s1807_s1 + $0x270] sm:$0xff]  ;;  %v504_v19 = vld [vmem:[%s1809_s3] sm:$0xff] }
  0x36   :  { %1088 = vmatprep.subr.bf16.mxu0 %v1087_v51  ;;  %v121_v12 = vld [vmem:[%s1807_s1 + $0x278] sm:$0xff]  ;;  %v1127_v14 = vpack.c.bf16 %v169_v7, %v168_v6  ;;  %v152_v15 = vld [vmem:[%s1807_s1 + $0x370] sm:$0xff]  ;;  %v505_v20 = vld [vmem:[%s1809_s3 + $0x8] sm:$0xff] }
  0x37   :  { %1118 = vmatpush3.bf16.msra.mxu1 %v1117_v50  ;;  %v153_v16 = vld [vmem:[%s1807_s1 + $0x378] sm:$0xff]  ;;  %v1097_v17 = vpack.c.bf16 %v121_v12, %v120_v11  ;;  %v1132_v21 = vpack.c.bf16 %v505_v20, %v504_v19  ;;  %v506_v23 = vld [vmem:[%s1809_s3 + $0x10] sm:$0xff]  ;;  %v592_v27 = vld [vmem:[%s1811_s5] sm:$0xff] }
  0x38   :  { %1120 = vmatprep.subr.bf16.mxu1 %v1119_v54  ;;  %v1129_v18 = vpack.c.bf16 %v153_v16, %v152_v15  ;;  %v507_v24 = vld [vmem:[%s1809_s3 + $0x18] sm:$0xff]  ;;  %v593_v28 = vld [vmem:[%s1811_s5 + $0x8] sm:$0xff]  ;;  %v808_v31 = vld [vmem:[%s1808_s2] ss:$0 sm:$0xff] }
  0x39   :  { %1090 = vmatpush3.bf16.msra.mxu0 %v1089_v60  ;;  %v1135_v25 = vpack.c.bf16 %v507_v24, %v506_v23  ;;  %v1138_v29 = vpack.c.bf16 %v593_v28, %v592_v27  ;;  %v676_v46 = vld [vmem:[%s1813_s7] sm:$0xff]  ;;  %v677_v47 = vld [vmem:[%s1813_s7 + $0x8] sm:$0xff]  ;;  %v594_v13 = vld [vmem:[%s1811_s5 + $0x10] sm:$0xff] }
  0x3a   :  { %1092 = vmatprep.subr.bf16.mxu0 %v1091_v62  ;;  %v1144_v50 = vpack.c.bf16 %v677_v47, %v676_v46  ;;  %v595_v52 = vld [vmem:[%s1811_s5 + $0x18] sm:$0xff]  ;;  %v678_v53 = vld [vmem:[%s1813_s7 + $0x10] sm:$0xff]  ;;  %v809_v57 = vld [vmem:[%s1810_s4] ss:$0 sm:$0xff]  ;;  %s783_s4 = sshll.u32 %s1234_s14, 4  ;;  %s784_s4 = int_to_ptr.vmem [resolvable:$true] %s783_s4 }
  0x3b   :  { %1122 = vmatpush3.bf16.msra.mxu1 %v1121_v61  ;;  %v1141_v54 = vpack.c.bf16 %v595_v52, %v594_v13  ;;  %v679_v55 = vld [vmem:[%s1813_s7 + $0x18] sm:$0xff]  ;;  %v811_v63 = vld [vmem:[%s1812_s6] ss:$0 sm:$0xff]  ;;  %s1160_s6 = scalar_lea.vmem %s784_s4, 32  ;;  %p1165_p1 = scmp.lt.s32.totalorder %s784_s4, %s784_s4 }
  0x3c   :  { %1124 = vmatprep.subr.bf16.mxu1 %v1123_v2  ;;  %v1147_v56 = vpack.c.bf16 %v679_v55, %v678_v53  ;;  %v813_v0 = vld [vmem:[%s1814_s8] ss:$0 sm:$0xff]  ;;  %p1161_p0 = scmp.ne.s32.totalorder %s784_s4, %s1160_s6  ;;  %p1166_p2 = scmp.lt.s32.totalorder %s1160_s6, %s1160_s6 }
  0x3d   :  { %1094 = vmatpush3.bf16.msra.mxu0 %v1093_v8 }
  0x3e   :  { %1096 = vmatprep.subr.bf16.mxu0 %v1095_v10  ;;  %p1167_p3 = por %p1166_p2, %p1165_p1 }
  0x3f   :  { %1126 = vmatpush3.bf16.msra.mxu1 %v1125_v9 }
  0x40   :  { %1128 = vmatprep.subr.bf16.mxu1 %v1127_v14  ;;  %p1168_p4 = pnand %p1167_p3, %p1161_p0 }
  0x41   :  { %1098 = vmatpush3.bf16.msra.mxu0 %v1097_v17 }
  0x42   :  { %1131 = vmatprep.subr.bf16.mxu0 %v1231_v22 }
  0x43   :  { %1130 = vmatpush3.bf16.msra.mxu1 %v1129_v18 }
  0x44   :  { %426 = vmatmul.mubr.f32.vlgmr.msra.gmra.mrb[2].mxu0 %v1613_v33  ;;  %1137 = vmatprep.subr.bf16.mxu1 %v1231_v22 }
  0x45   :  { %1133 = vmatpush3.bf16.msra.mxu0 %v1132_v21  ;;  %978 = vmatprep.mubr.msk.f32.mxu0 %vm1232_vm0, %v1233_v26 }
  0x46   :  { %496 = vmatmul.mubr.f32.vlgmr.msra.gmra.mrb[2].mxu1 %v210_v45  ;;  %1134 = vmatprep.subr.bf16.mxu0 %v1231_v22 }
  0x47   :  { %989 = vmatprep.mubr.msk.f32.mxu1 %vm1232_vm0, %v1233_v26  ;;  %1139 = vmatpush3.bf16.msra.mxu1 %v1138_v29 }
  0x48   :  { %1140 = vmatprep.subr.bf16.mxu1 %v1231_v22 }
  0x49   :  { %1136 = vmatpush3.bf16.msra.mxu0 %v1135_v25 }
  0x4a   :  { %1143 = vmatprep.subr.bf16.mxu0 %v1231_v22 }
  0x4b   :  { %1142 = vmatpush3.bf16.msra.mxu1 %v1141_v54 }
  0xf7   :  { %v847_v30 = vpop.f32.mrb[0].mxu0 }
  0xf8   :  { %v848_v32 = vpop.f32.mrb[1].mxu0 }
  0xf9   :  { %v882_v33 = vpop.f32.mrb[0].mxu1  ;;  %v849_v34 = vadd.f32 %v848_v32, %v847_v30 }
  0xfa   :  { %v883_v35 = vpop.f32.mrb[1].mxu1 }
  0xfb   :  { %v884_v36 = vadd.f32 %v883_v35, %v882_v33  ;;  %v288_v37 = vadd.f32 %v849_v34, %v808_v31 }
  0xfd   :  { %v358_v38 = vadd.f32 %v884_v36, %v288_v37 }
 0x117   :  { %v917_v39 = vpop.f32.mrb[2].mxu0 }
 0x118   :  { %v918_v40 = vpop.f32.mrb[3].mxu0 }
 0x119   :  { %v952_v41 = vpop.f32.mrb[2].mxu1  ;;  %v919_v42 = vadd.f32 %v918_v40, %v917_v39 }
 0x11a   :  { %v953_v43 = vpop.f32.mrb[3].mxu1 }
 0x11b   :  { %v954_v44 = vadd.f32 %v953_v43, %v952_v41  ;;  %v428_v45 = vadd.f32 %v919_v42, %v358_v38 }
 0x11d   :  { %v498_v48 = vadd.f32 %v954_v44, %v428_v45 }
 0x11f   :  { %vm501_vm1 = vcmp.ge.f32.partialorder %v498_v48, 0.0  ;;  %v502_v49 = vmul.f32 0.2, %v498_v48 }
 0x121   :  { %v503_v51 = vsel %vm501_vm1, %v498_v48, %v502_v49 }
 0x122   :  { %979 = vmatmul.mubr.msk.f32.vlgmr.msra.gmra.mrb[4].mxu0 %vm515_vm2, %v503_v51 }
 0x123   :  { %1145 = vmatpush3.bf16.msra.mxu0 %v1144_v50  ;;  %1000 = vmatprep.mubr.msk.f32.mxu0 %vm1232_vm0, %v1233_v26 }
 0x124   :  { %1146 = vmatprep.subr.bf16.mxu0 %v1231_v22 }
 0x127   :  { %1148 = vmatpush3.bf16.msra.mxu0 %v1147_v56 }
 0x1f5   :  { %v585_v58 = vpop.f32.mrb[4].mxu0 }
 0x1f6   :  { %v586_v59 = vadd.f32 %v809_v57, %v585_v58  ;;  %v980_v60 = vpop.f32.mrb[5].mxu0 }
 0x1f8   :  { %vm589_vm3 = vcmp.ge.f32.partialorder %v586_v59, 0.0  ;;  %v590_v61 = vmul.f32 0.2, %v586_v59 }
 0x1fa   :  { %v591_v62 = vsel %vm589_vm3, %v586_v59, %v590_v61 }
 0x1fb   :  { %990 = vmatmul.mubr.msk.f32.vlgmr.msra.gmra.mrb[4].mxu1 %vm515_vm2, %v591_v62  ;;  %1001 = vmatmul.mubr.msk.f32.vlgmr.msra.gmra.mrb[6].mxu0 %vm515_vm2, %v591_v62 }
 0x2ce   :  { %v672_v1 = vpop.f32.mrb[4].mxu1  ;;  %v753_v2 = vpop.f32.mrb[6].mxu0 }
 0x2cf   :  { %v673_v3 = vadd.f32 %v811_v63, %v672_v1  ;;  %v754_v4 = vadd.f32 %v813_v0, %v753_v2  ;;  %v991_v5 = vpop.f32.mrb[5].mxu1  ;;  %v1002_v6 = vpop.f32.mrb[7].mxu0 }
 0x2d1   :  { %v761_v7 = vmul.f32 0.5, %v754_v4  ;;  %758 = vst.msk [vmem:[#allocation4] sm:$0x3] %vm757_vm4, %v673_v3  ;;  %759 = vst.msk [vmem:[#allocation6] sm:$0x3] %vm757_vm4, %v754_v4 }
 0x2d2   :  { %1171 = shalt.err (!%p1168_p4)
}
 0x2d3   :  { %s1172_s3 = scalar_lea.hbm %s1817_s11, 32 }
 0x2d4   :  { %p1173_p5 = scmp.ne.s32.totalorder %s1817_s11, %s1172_s3  ;;  %p1176_p6 = scmp.lt.u32.totalorder %s1172_s3, %s1817_s11 }
 0x2d6   :  { %p1178_p7 = pnand %p1176_p6, %p1173_p5 }
 0x2d8   :  { %1181 = shalt.err (!%p1178_p7)
}
 0x2d9   :  { %786 = dma.vmem_to_hbm [thread:$0]  %s784_s4, 32, %s1817_s11, [#allocation5]   ;;  %v762_v8 = vmul.f32 1.442695, %v761_v7 }
 0x2da   :  { %s1182_s23 = scalar_lea.vmem %s1757_s16, 32  ;;  %p1187_p9 = scmp.lt.s32.totalorder %s1757_s16, %s1757_s16 }
 0x2db   :  { %p1183_p8 = scmp.ne.s32.totalorder %s1757_s16, %s1182_s23  ;;  %p1188_p10 = scmp.lt.s32.totalorder %s1182_s23, %s1182_s23 }
 0x2dd   :  { %p1189_p11 = por %p1188_p10, %p1187_p9 }
 0x2df   :  { %p1190_p12 = pnand %p1189_p11, %p1183_p8 }
 0x2e1   :  { %1193 = shalt.err (!%p1190_p12)
}
 0x2e2   :  { %s1194_s26 = scalar_lea.hbm %s1818_s12, 32 }
 0x2e3   :  { %p1195_p13 = scmp.ne.s32.totalorder %s1818_s12, %s1194_s26  ;;  %p1198_p0 = scmp.lt.u32.totalorder %s1194_s26, %s1818_s12 }
 0x2e5   :  { %p1200_p1 = pnand %p1198_p0, %p1195_p13 }
 0x2e7   :  { %1203 = shalt.err (!%p1200_p1)
}
 0x2e8   :  { %796 = dma.vmem_to_hbm [thread:$0]  %s1757_s16, 32, %s1818_s12, [#allocation5]   ;;  %1158 = vpow2.f32 %v762_v8  ;;  %v760_v9 = vld [vmem:[%s1815_s9] sm:$0x3] }
 0x2e9   :  { %s1236_s7 = smov [#allocation2]  }
 0x2ea   :  { %s773_s13 = sshll.u32 %s1236_s7, 4  ;;  %s774_s13 = int_to_ptr.vmem [resolvable:$true] %s773_s13 }
 0x2eb   :  { %s1204_s14 = scalar_lea.vmem %s774_s13, 32  ;;  %p1209_p3 = scmp.lt.s32.totalorder %s774_s13, %s774_s13 }
 0x2ec   :  { %p1205_p2 = scmp.ne.s32.totalorder %s774_s13, %s1204_s14  ;;  %p1210_p4 = scmp.lt.s32.totalorder %s1204_s14, %s1204_s14 }
 0x2ee   :  { %p1211_p5 = por %p1210_p4, %p1209_p3 }
 0x2f0   :  { %p1212_p6 = pnand %p1211_p5, %p1205_p2 }
 0x2f2   :  { %v1159_v10 = vpop.eup %1158 }
 0x2f3   :  { %v764_v11 = vmul.f32 %v1159_v10, %v760_v9 }
 0x2f5   :  { %v765_v12 = vadd.f32 %v764_v11, %v673_v3 }
 0x2f7   :  { %766 = vst.msk [vmem:[#allocation2] sm:$0x3] %vm757_vm4, %v765_v12 }
 0x2f8   :  { %1215 = shalt.err (!%p1212_p6)
}
 0x2f9   :  { %s1216_s15 = scalar_lea.hbm %s1816_s10, 32 }
 0x2fa   :  { %p1217_p7 = scmp.ne.s32.totalorder %s1816_s10, %s1216_s15  ;;  %p1220_p8 = scmp.lt.u32.totalorder %s1216_s15, %s1816_s10 }
 0x2fc   :  { %p1222_p9 = pnand %p1220_p8, %p1217_p7 }
 0x2fe   :  { %1225 = shalt.err (!%p1222_p9)
}
 0x2ff   :  { %776 = dma.vmem_to_hbm [thread:$0]  %s774_s13, 32, %s1816_s10, [#allocation3]  }
 0x300   :  { %1226 = dma.done.wait [#allocation3], 32  }
 0x301   :  { %1227 = vsyncadd [#allocation3], 4294967264 }
 0x302   :  { %1228 = dma.done.wait [#allocation5], 64  }
 0x303   :  { %1229 = vsyncadd [#allocation5], 4294967232 }
 0x304   :  { %806 = vsyncpa [#allocation3], 1 }
 0x305   :  { %807 = vsyncpa [#allocation5], 1 }

</bundles_post_ra>
